<compile_context>
chip_gen: v7x
topology: tpu7x:2x2x1
jax: 0.10.0
libtpu: 0.0.40
codegen_flags: <defaults>
</compile_context>

<pallas_src>
import jax
import jax.numpy as jnp
from jax.experimental import pallas as pl
from jax.experimental.pallas import tpu as pltpu


_CHUNK_MIN_BYTES = 1 << 20   # only bother chunking copies >= 1 MiB
_MAX_CHUNKS = 4              # a handful of concurrent DMAs is plenty


def _make_copy_kernel(chunk_bounds):
    """Kernel that copies the whole input HBM ref to the output HBM ref.

    chunk_bounds: list of (start, size) static slices along the leading dim,
    or None to copy the full ref with a single DMA.
    """

    def kernel(x_hbm, o_hbm, sems):
        if chunk_bounds is None:
            cp = pltpu.make_async_copy(x_hbm, o_hbm, sems.at[0])
            cp.start()
            cp.wait()
            return
        copies = []
        for idx, (start, size) in enumerate(chunk_bounds):
            cp = pltpu.make_async_copy(
                x_hbm.at[pl.ds(start, size)],
                o_hbm.at[pl.ds(start, size)],
                sems.at[idx],
            )
            cp.start()
            copies.append(cp)
        # Start all DMAs first (overlap the engines), then wait for all.
        for cp in copies:
            cp.wait()

    return kernel


def _pallas_identity(x: jax.Array) -> jax.Array:
    """Materialized identity: direct HBM->HBM DMA copy (no VMEM staging)."""
    nbytes = x.size * jnp.dtype(x.dtype).itemsize
    lead = x.shape[0] if x.ndim >= 1 else 1

    if x.ndim >= 1 and lead >= 2 and nbytes >= _CHUNK_MIN_BYTES:
        n_chunks = min(_MAX_CHUNKS, lead)
        base, rem = divmod(lead, n_chunks)
        chunk_bounds = []
        start = 0
        for i in range(n_chunks):
            size = base + (1 if i < rem else 0)
            chunk_bounds.append((start, size))
            start += size
    else:
        n_chunks = 1
        chunk_bounds = None

    return pl.pallas_call(
        _make_copy_kernel(chunk_bounds),
        out_shape=jax.ShapeDtypeStruct(x.shape, x.dtype),
        in_specs=[pl.BlockSpec(memory_space=pl.ANY)],
        out_specs=pl.BlockSpec(memory_space=pl.ANY),
        scratch_shapes=[pltpu.SemaphoreType.DMA((n_chunks,))],
    )(x)


def basic_module_forward(x: jax.Array, *, materialize: bool = False) -> jax.Array:
    """BasicModule.forward — a no-op.

    Default path: return the input unchanged (zero HBM traffic; the faithful
    translation of a `pass` forward).  `materialize=True` runs an explicit
    Pallas HBM->HBM DMA copy producing a fresh output buffer.
    """
    if not materialize:
        return x
    return _pallas_identity(x)


# TODO(synk): init_pretrained_weights / save_* / resume_state / load_dict are
# host-side checkpoint I/O with no Pallas equivalent; glorot()/init() are
# parameter initializers for subclasses (this base class owns no parameters).


if __name__ == "__main__":
    key = jax.random.PRNGKey(0)

    # Shapes consistent with an NCHW vision-style module.
    x = jax.random.normal(key, (2, 4, 16, 16), dtype=jnp.float32)

    # Fast (faithful) path: identity, no kernel, no copy.
    y0 = basic_module_forward(x)
    assert y0 is x

    # Explicit Pallas path (single-DMA branch): run once and verify.
    expected = jnp.array(x, copy=True)
    y = jax.block_until_ready(basic_module_forward(x, materialize=True))
    assert y.shape == expected.shape and y.dtype == expected.dtype
    assert bool(jnp.all(y == expected))

    # Exercise the chunked-DMA branch with a >=1 MiB input (still small).
    key2 = jax.random.PRNGKey(0)
    x_big = jax.random.normal(key2, (8, 256, 256), dtype=jnp.float32)  # 2 MiB
    y_big = jax.block_until_ready(basic_module_forward(x_big, materialize=True))
    assert bool(jnp.all(y_big == x_big))

    print("KERNEL_OK")
</pallas_src>

<mosaic_0001>
module attributes {stable_mosaic.version = 11 : i64} {
  func.func @kernel(%arg0: memref<2x4x16x16xf32, #tpu.memory_space<any>>, %arg1: memref<2x4x16x16xf32, #tpu.memory_space<any>>, %arg2: memref<1x!tpu.dma_semaphore, #tpu.memory_space<semaphore_mem>>) attributes {dimension_semantics = [], scalar_prefetch = 0 : i64, scratch_operands = 1 : i64, tpu.core_type = #tpu.core_type<tc>} {
    %c0_i32 = arith.constant 0 : i32
    %0 = tpu.memref_slice %arg2[%c0_i32] : memref<1x!tpu.dma_semaphore, #tpu.memory_space<semaphore_mem>> -> memref<1x!tpu.dma_semaphore, #tpu.memory_space<semaphore_mem>>
    %1 = tpu.memref_squeeze %0 : memref<1x!tpu.dma_semaphore, #tpu.memory_space<semaphore_mem>> -> memref<!tpu.dma_semaphore, #tpu.memory_space<semaphore_mem>>
    tpu.enqueue_dma source(%arg0 : memref<2x4x16x16xf32, #tpu.memory_space<any>>) target(%arg1 : memref<2x4x16x16xf32, #tpu.memory_space<any>>) target_semaphore(%1 : memref<!tpu.dma_semaphore, #tpu.memory_space<semaphore_mem>>)
    %c0_i32_0 = arith.constant 0 : i32
    %2 = tpu.memref_slice %arg2[%c0_i32_0] : memref<1x!tpu.dma_semaphore, #tpu.memory_space<semaphore_mem>> -> memref<1x!tpu.dma_semaphore, #tpu.memory_space<semaphore_mem>>
    %3 = tpu.memref_squeeze %2 : memref<1x!tpu.dma_semaphore, #tpu.memory_space<semaphore_mem>> -> memref<!tpu.dma_semaphore, #tpu.memory_space<semaphore_mem>>
    tpu.wait_dma2 semaphore(%3 : memref<!tpu.dma_semaphore, #tpu.memory_space<semaphore_mem>>) src(%arg0 : memref<2x4x16x16xf32, #tpu.memory_space<any>>) dst(%arg1 : memref<2x4x16x16xf32, #tpu.memory_space<any>>)
    return
  }
}

</mosaic_0001>

<bundles_post_ra>
// kernel: tpu_custom_call.1
= control target key start
LH: loop header
LB: loop body
LE: loop exit
PB: predicated region body
PF: predicated region fallthrough
CT: control target
= control target key end

     0   :  { %s36_s6 = smov [#allocation2]   ;;  %s37_s7 = smov [#allocation3]   ;;  %s55_s0 = inlined_call_operand.hbm [shape: f32[2,4,16,16], index: 0, kind: input, shape index: {}]   ;;  %s56_s1 = inlined_call_operand.hbm [shape: f32[2,4,16,16], index: 1, kind: output, shape index: {}]  }
   0x1   :  { %s38_s8 = smov 0  }
   0x2   :  { %18 = dma.general %s55_s0, 2048, %s56_s1, %s36_s6, %s37_s7, [#allocation4], %s38_s8, 0  }
   0x3   :  { %34 = dma.done.wait [#allocation2], 2048 }
   0x4   :  { %35 = vsyncadd [#allocation2], 4294965248 }
   0x5   :  { %24 = vsyncmov [#allocation2] }
   0x8   :  { %s25_s13 = vpop.sfrf %24 }
   0x9   :  { %p30_p0 = scmp.ne.s32.totalorder %s25_s13, 0 }
   0xb   :  { %29 = shalt.err (%p30_p0)  }

</bundles_post_ra>
